<compile_context>
chip_gen: v7x
topology: tpu7x:2x2x1
jax: 0.10.0
libtpu: 0.0.40
codegen_flags: <defaults>
</compile_context>

<pallas_src>
import math

import jax
import jax.numpy as jnp
from jax.experimental import pallas as pl
from jax.experimental.pallas import tpu as pltpu


def _round_up(x: int, m: int) -> int:
    return ((x + m - 1) // m) * m


def _choose_batch_tile(B: int, block_b: int, min_steps: int) -> int:
    """Pick a batch tile (multiple of 8) that keeps >= min_steps grid steps
    when the batch allows it and keeps batch padding under ~10%."""
    b8 = _round_up(B, 8)
    tb = min(block_b, _round_up(pl.cdiv(b8, min_steps), 8))
    tb = max(tb, 8)
    # Shrink the tile while padded rows exceed ~10% of the real batch.
    while tb > 8 and (_round_up(B, tb) - B) * 10 > B:
        tb -= 8
    return tb


def _critic_kernel(x_ref, w1_ref, b1_ref, w2s_ref, w2a_ref, b2_ref,
                   w3_ref, b3_ref, q_ref):
    # x = [state | action | zero pad], lane-dense (TB, 128). Cast once to bf16
    # for the MXU; all accumulation is f32 via preferred_element_type.
    x_bf = x_ref[...].astype(jnp.bfloat16)

    # fc1 + ReLU. w1's action/pad rows are zero, so x @ w1 == state @ W1.
    h1 = jnp.dot(x_bf, w1_ref[...], preferred_element_type=jnp.float32)
    h1 = jnp.maximum(h1 + b1_ref[...], 0.0)   # f32 elementwise (v5e-safe)

    # fc2 on concat([h1, action]) == h1 @ W2_h + action @ W2_a (+ b2), ReLU.
    # w2a's state/pad rows are zero, so x @ w2a == action @ W2_a.
    h2 = jnp.dot(h1.astype(jnp.bfloat16), w2s_ref[...],
                 preferred_element_type=jnp.float32)
    h2 = h2 + jnp.dot(x_bf, w2a_ref[...], preferred_element_type=jnp.float32)
    h2 = jnp.maximum(h2 + b2_ref[...], 0.0)

    # fc3 on the MXU against a lane-dense (h1p, 128) weight slab whose only
    # live column is 0 -> dense (TB, 128) output block, unmasked stores.
    q = jnp.dot(h2.astype(jnp.bfloat16), w3_ref[...],
                preferred_element_type=jnp.float32)
    q_ref[...] = (q + b3_ref[...]).astype(q_ref.dtype)


def critic_forward(state, action, params, *, block_b: int = 1024,
                   min_steps: int = 2):
    """Fused Critic forward: q = fc3(relu(fc2(cat(relu(fc1(s)), a))))."""
    w1, b1, w2s, w2a, b2, w3, b3 = params
    B, state_dim = state.shape
    action_dim = action.shape[1]
    in_p = w1.shape[0]       # padded (state+action) lane width (128)
    h0p = w1.shape[1]
    h1p = w2s.shape[1]
    outp = w3.shape[1]       # padded output lane width (128)

    # Batch tiling: TB rows per grid step, >= min_steps steps when possible.
    TB = _choose_batch_tile(B, block_b, min_steps)
    Bp = _round_up(B, TB)
    grid = (Bp // TB,)

    # One lane-dense input: [state | action | zero pad], batch-padded to Bp.
    x = jnp.concatenate([state, action], axis=1)
    x = jnp.pad(x, ((0, Bp - B), (0, in_p - x.shape[1])))

    batch_map = lambda i: (i, 0)   # tiles over the batch
    const_map = lambda i: (0, 0)   # weights/biases stay resident in VMEM

    in_specs = [
        pl.BlockSpec((TB, in_p), batch_map),     # x  (f32)
        pl.BlockSpec((in_p, h0p), const_map),    # w1 (bf16)
        pl.BlockSpec((1, h0p), const_map),       # b1 (f32)
        pl.BlockSpec((h0p, h1p), const_map),     # w2s (bf16)
        pl.BlockSpec((in_p, h1p), const_map),    # w2a (bf16)
        pl.BlockSpec((1, h1p), const_map),       # b2 (f32)
        pl.BlockSpec((h1p, outp), const_map),    # w3 (bf16, lane-dense)
        pl.BlockSpec((1, outp), const_map),      # b3 (f32, lane-dense)
    ]
    out_specs = pl.BlockSpec((TB, outp), batch_map)

    flops = 2 * Bp * (in_p * h0p + h0p * h1p + in_p * h1p + h1p * outp)
    bytes_accessed = int(x.size) * x.dtype.itemsize
    bytes_accessed += sum(int(p.size) * p.dtype.itemsize for p in params)
    bytes_accessed += Bp * outp * 4

    q_padded = pl.pallas_call(
        _critic_kernel,
        out_shape=jax.ShapeDtypeStruct((Bp, outp), jnp.float32),
        grid=grid,
        in_specs=in_specs,
        out_specs=out_specs,
        compiler_params=pltpu.CompilerParams(
            dimension_semantics=("parallel",)),
        cost_estimate=pl.CostEstimate(flops=flops, transcendentals=0,
                                      bytes_accessed=bytes_accessed),
    )(x, w1, b1, w2s, w2a, b2, w3, b3)

    # Only column 0 and the first B rows are live.
    return q_padded[:B, :1]


def init_critic_params(key, state_dim, action_dim, hidden_dims=(400, 300),
                       *, lane_pad=128, out_pad=128):
    """Init mirroring the PyTorch module. Hidden dims, the merged
    (state+action) input width, and the output width are zero-padded to lane
    multiples; padding is all zeros, so the forward pass is mathematically
    identical to the unpadded module (up to bf16 weight rounding)."""
    h0, h1 = hidden_dims
    h0p = _round_up(h0, lane_pad)
    h1p = _round_up(h1, lane_pad)
    in_p = _round_up(state_dim + action_dim, lane_pad)
    k1, k2, k3, k4 = jax.random.split(key, 4)

    def xavier_uniform(k, fan_in, fan_out):
        bound = math.sqrt(6.0 / (fan_in + fan_out))
        # stored as [in, out] (transpose of torch's [out, in]); same distribution
        return jax.random.uniform(k, (fan_in, fan_out), jnp.float32, -bound, bound)

    # fc1: state_dim -> h0, xavier uniform, zero bias. Embedded into the
    # merged [state|action|pad] input: only rows [0, state_dim) are non-zero.
    w1 = xavier_uniform(k1, state_dim, h0)
    w1f = (jnp.zeros((in_p, h0p), jnp.float32)
           .at[:state_dim, :h0].set(w1).astype(jnp.bfloat16))
    b1 = jnp.zeros((1, h0p), jnp.float32)

    # fc2: (h0 + action_dim) -> h1, xavier uniform, zero bias. Split along the
    # input axis into the h1-part and the action-part (the latter embedded at
    # rows [state_dim, state_dim + action_dim) of the merged input).
    w2 = xavier_uniform(k2, h0 + action_dim, h1)
    w2s = (jnp.zeros((h0p, h1p), jnp.float32)
           .at[:h0, :h1].set(w2[:h0]).astype(jnp.bfloat16))
    w2a = (jnp.zeros((in_p, h1p), jnp.float32)
           .at[state_dim:state_dim + action_dim, :h1].set(w2[h0:])
           .astype(jnp.bfloat16))
    b2 = jnp.zeros((1, h1p), jnp.float32)

    # fc3: h1 -> 1, uniform(-0.003, 0.003); stored lane-dense as (h1p, out_pad)
    # bf16 with only column 0 live, bias as a (1, out_pad) f32 row.
    w3 = jax.random.uniform(k3, (h1, 1), jnp.float32, -0.003, 0.003)
    w3f = (jnp.zeros((h1p, out_pad), jnp.float32)
           .at[:h1, :1].set(w3).astype(jnp.bfloat16))
    b3 = jax.random.uniform(k4, (), jnp.float32, -0.003, 0.003)
    b3f = jnp.zeros((1, out_pad), jnp.float32).at[0, 0].set(b3)

    return (w1f, b1, w2s, w2a, b2, w3f, b3f)


def critic_forward_ref(state, action, params):
    """Plain-JAX f32 reference (matches the PyTorch forward semantics)."""
    w1, b1, w2s, w2a, b2, w3, b3 = params
    sa = jnp.concatenate([state, action], axis=1)
    sa = jnp.pad(sa, ((0, 0), (0, w1.shape[0] - sa.shape[1])))
    h1 = jnp.maximum(sa @ w1.astype(jnp.float32) + b1, 0.0)
    h2 = jnp.maximum(h1 @ w2s.astype(jnp.float32)
                     + sa @ w2a.astype(jnp.float32) + b2, 0.0)
    q = h2 @ w3.astype(jnp.float32) + b3
    return q[:, :1]


if __name__ == "__main__":
    key = jax.random.PRNGKey(0)
    k_params, k_state, k_action = jax.random.split(key, 3)

    # small shapes consistent with the module's forward
    batch = 8
    state_dim = 16
    action_dim = 4
    hidden_dims = (64, 32)   # padded internally to (128, 128)

    params = init_critic_params(k_params, state_dim, action_dim, hidden_dims)
    state = jax.random.normal(k_state, (batch, state_dim), jnp.float32)
    action = jax.random.normal(k_action, (batch, action_dim), jnp.float32)

    q = critic_forward(state, action, params)
    q = jax.block_until_ready(q)

    q_ref = critic_forward_ref(state, action, params)
    assert q.shape == (batch, 1)
    # bf16 matmul inputs -> compare against the f32 reference with a small tolerance
    assert jnp.allclose(q, q_ref, atol=5e-3, rtol=2e-2), (q, q_ref)

    print("KERNEL_OK")
</pallas_src>

<mosaic_0001>
module attributes {stable_mosaic.version = 11 : i64} {
  func.func @_critic_kernel(%arg0: i32, %arg1: memref<8x128xf32, #tpu.memory_space<vmem>>, %arg2: memref<128x128xbf16, #tpu.memory_space<vmem>>, %arg3: memref<1x128xf32, #tpu.memory_space<vmem>>, %arg4: memref<128x128xbf16, #tpu.memory_space<vmem>>, %arg5: memref<128x128xbf16, #tpu.memory_space<vmem>>, %arg6: memref<1x128xf32, #tpu.memory_space<vmem>>, %arg7: memref<128x128xbf16, #tpu.memory_space<vmem>>, %arg8: memref<1x128xf32, #tpu.memory_space<vmem>>, %arg9: memref<8x128xf32, #tpu.memory_space<vmem>>) attributes {dimension_semantics = [#tpu.dimension_semantics<parallel>], iteration_bounds = array<i64: 1>, scalar_prefetch = 0 : i64, scratch_operands = 0 : i64, tpu.core_type = #tpu.core_type<tc>, window_params = [{transform_indices = @transform_0, window_bounds = array<i64: 8, 128>}, {pipeline_mode = #tpu.pipeline_mode<synchronous>, transform_indices = @transform_1, window_bounds = array<i64: 128, 128>}, {pipeline_mode = #tpu.pipeline_mode<synchronous>, transform_indices = @transform_2, window_bounds = array<i64: 1, 128>}, {pipeline_mode = #tpu.pipeline_mode<synchronous>, transform_indices = @transform_3, window_bounds = array<i64: 128, 128>}, {pipeline_mode = #tpu.pipeline_mode<synchronous>, transform_indices = @transform_4, window_bounds = array<i64: 128, 128>}, {pipeline_mode = #tpu.pipeline_mode<synchronous>, transform_indices = @transform_5, window_bounds = array<i64: 1, 128>}, {pipeline_mode = #tpu.pipeline_mode<synchronous>, transform_indices = @transform_6, window_bounds = array<i64: 128, 128>}, {pipeline_mode = #tpu.pipeline_mode<synchronous>, transform_indices = @transform_7, window_bounds = array<i64: 1, 128>}, {transform_indices = @transform_8, window_bounds = array<i64: 8, 128>}]} {
    %c0 = arith.constant 0 : index
    %c0_0 = arith.constant 0 : index
    %0 = vector.load %arg1[%c0, %c0_0] : memref<8x128xf32, #tpu.memory_space<vmem>>, vector<8x128xf32>
    %1 = arith.truncf %0 : vector<8x128xf32> to vector<8x128xbf16>
    %c0_1 = arith.constant 0 : index
    %c0_2 = arith.constant 0 : index
    %2 = vector.load %arg2[%c0_1, %c0_2] : memref<128x128xbf16, #tpu.memory_space<vmem>>, vector<128x128xbf16>
    %cst = arith.constant dense<0.000000e+00> : vector<8x128xf32>
    %3 = tpu.matmul %1, %2, %cst {dimension_numbers = #tpu.dot_dimension_numbers<[1], [0], [0], [1], [0, 0, 1, 1], [], []>} : vector<8x128xbf16>, vector<128x128xbf16>, vector<8x128xf32> -> vector<8x128xf32>
    %c0_3 = arith.constant 0 : index
    %c0_4 = arith.constant 0 : index
    %4 = vector.load %arg3[%c0_3, %c0_4] : memref<1x128xf32, #tpu.memory_space<vmem>>, vector<1x128xf32>
    %5 = vector.broadcast %4 : vector<1x128xf32> to vector<8x128xf32>
    %6 = arith.addf %3, %5 : vector<8x128xf32>
    %cst_5 = arith.constant 0.000000e+00 : f32
    %7 = vector.broadcast %cst_5 : f32 to vector<8x128xf32>
    %8 = arith.maximumf %6, %7 : vector<8x128xf32>
    %9 = arith.truncf %8 : vector<8x128xf32> to vector<8x128xbf16>
    %c0_6 = arith.constant 0 : index
    %c0_7 = arith.constant 0 : index
    %10 = vector.load %arg4[%c0_6, %c0_7] : memref<128x128xbf16, #tpu.memory_space<vmem>>, vector<128x128xbf16>
    %cst_8 = arith.constant dense<0.000000e+00> : vector<8x128xf32>
    %11 = tpu.matmul %9, %10, %cst_8 {dimension_numbers = #tpu.dot_dimension_numbers<[1], [0], [0], [1], [0, 0, 1, 1], [], []>} : vector<8x128xbf16>, vector<128x128xbf16>, vector<8x128xf32> -> vector<8x128xf32>
    %c0_9 = arith.constant 0 : index
    %c0_10 = arith.constant 0 : index
    %12 = vector.load %arg5[%c0_9, %c0_10] : memref<128x128xbf16, #tpu.memory_space<vmem>>, vector<128x128xbf16>
    %cst_11 = arith.constant dense<0.000000e+00> : vector<8x128xf32>
    %13 = tpu.matmul %1, %12, %cst_11 {dimension_numbers = #tpu.dot_dimension_numbers<[1], [0], [0], [1], [0, 0, 1, 1], [], []>} : vector<8x128xbf16>, vector<128x128xbf16>, vector<8x128xf32> -> vector<8x128xf32>
    %14 = arith.addf %11, %13 : vector<8x128xf32>
    %c0_12 = arith.constant 0 : index
    %c0_13 = arith.constant 0 : index
    %15 = vector.load %arg6[%c0_12, %c0_13] : memref<1x128xf32, #tpu.memory_space<vmem>>, vector<1x128xf32>
    %16 = vector.broadcast %15 : vector<1x128xf32> to vector<8x128xf32>
    %17 = arith.addf %14, %16 : vector<8x128xf32>
    %cst_14 = arith.constant 0.000000e+00 : f32
    %18 = vector.broadcast %cst_14 : f32 to vector<8x128xf32>
    %19 = arith.maximumf %17, %18 : vector<8x128xf32>
    %20 = arith.truncf %19 : vector<8x128xf32> to vector<8x128xbf16>
    %c0_15 = arith.constant 0 : index
    %c0_16 = arith.constant 0 : index
    %21 = vector.load %arg7[%c0_15, %c0_16] : memref<128x128xbf16, #tpu.memory_space<vmem>>, vector<128x128xbf16>
    %cst_17 = arith.constant dense<0.000000e+00> : vector<8x128xf32>
    %22 = tpu.matmul %20, %21, %cst_17 {dimension_numbers = #tpu.dot_dimension_numbers<[1], [0], [0], [1], [0, 0, 1, 1], [], []>} : vector<8x128xbf16>, vector<128x128xbf16>, vector<8x128xf32> -> vector<8x128xf32>
    %c0_18 = arith.constant 0 : index
    %c0_19 = arith.constant 0 : index
    %23 = vector.load %arg8[%c0_18, %c0_19] : memref<1x128xf32, #tpu.memory_space<vmem>>, vector<1x128xf32>
    %24 = vector.broadcast %23 : vector<1x128xf32> to vector<8x128xf32>
    %25 = arith.addf %22, %24 : vector<8x128xf32>
    %c0_20 = arith.constant 0 : index
    %c0_21 = arith.constant 0 : index
    %26 = vector.load %arg9[%c0_20, %c0_21] : memref<8x128xf32, #tpu.memory_space<vmem>>, vector<8x128xf32>
    tpu.vector_store %arg9[%c0_20, %c0_21], %25 {strides = array<i32>} : memref<8x128xf32, #tpu.memory_space<vmem>>, vector<8x128xf32>,
    return
  }
  func.func @transform_0(%arg0: i32) -> (i32, i32) {
    %c0_i32 = arith.constant 0 : i32
    %c0_i32_0 = arith.constant 0 : i32
    return %arg0, %c0_i32 : i32, i32
  }
  func.func @transform_1(%arg0: i32) -> (i32, i32) {
    %c0_i32 = arith.constant 0 : i32
    %c0_i32_0 = arith.constant 0 : i32
    %c0_i32_1 = arith.constant 0 : i32
    return %c0_i32, %c0_i32_0 : i32, i32
  }
  func.func @transform_2(%arg0: i32) -> (i32, i32) {
    %c0_i32 = arith.constant 0 : i32
    %c0_i32_0 = arith.constant 0 : i32
    %c0_i32_1 = arith.constant 0 : i32
    return %c0_i32, %c0_i32_0 : i32, i32
  }
  func.func @transform_3(%arg0: i32) -> (i32, i32) {
    %c0_i32 = arith.constant 0 : i32
    %c0_i32_0 = arith.constant 0 : i32
    %c0_i32_1 = arith.constant 0 : i32
    return %c0_i32, %c0_i32_0 : i32, i32
  }
  func.func @transform_4(%arg0: i32) -> (i32, i32) {
    %c0_i32 = arith.constant 0 : i32
    %c0_i32_0 = arith.constant 0 : i32
    %c0_i32_1 = arith.constant 0 : i32
    return %c0_i32, %c0_i32_0 : i32, i32
  }
  func.func @transform_5(%arg0: i32) -> (i32, i32) {
    %c0_i32 = arith.constant 0 : i32
    %c0_i32_0 = arith.constant 0 : i32
    %c0_i32_1 = arith.constant 0 : i32
    return %c0_i32, %c0_i32_0 : i32, i32
  }
  func.func @transform_6(%arg0: i32) -> (i32, i32) {
    %c0_i32 = arith.constant 0 : i32
    %c0_i32_0 = arith.constant 0 : i32
    %c0_i32_1 = arith.constant 0 : i32
    return %c0_i32, %c0_i32_0 : i32, i32
  }
  func.func @transform_7(%arg0: i32) -> (i32, i32) {
    %c0_i32 = arith.constant 0 : i32
    %c0_i32_0 = arith.constant 0 : i32
    %c0_i32_1 = arith.constant 0 : i32
    return %c0_i32, %c0_i32_0 : i32, i32
  }
  func.func @transform_8(%arg0: i32) -> (i32, i32) {
    %c0_i32 = arith.constant 0 : i32
    %c0_i32_0 = arith.constant 0 : i32
    return %arg0, %c0_i32 : i32, i32
  }
}

</mosaic_0001>

<bundles_post_ra>
// kernel: tpu_custom_call.1
= control target key start
LH: loop header
LB: loop body
LE: loop exit
PB: predicated region body
PF: predicated region fallthrough
CT: control target
= control target key end

     0   :  { %13 = vsyncpa [#allocation3], 0  ;;  %s1080_s0 = inlined_call_operand.hbm [shape: f32[8,128], index: 0, kind: input, shape index: {}]   ;;  %s1081_s1 = inlined_call_operand.hbm [shape: bf16[128,128], index: 1, kind: input, shape index: {}]   ;;  %s1082_s2 = inlined_call_operand.vmem [shape: f32[1,128], index: 2, kind: input, shape index: {}]   ;;  %s1083_s3 = inlined_call_operand.hbm [shape: bf16[128,128], index: 3, kind: input, shape index: {}]   ;;  %s1084_s4 = inlined_call_operand.hbm [shape: bf16[128,128], index: 4, kind: input, shape index: {}]   ;;  %s1085_s5 = inlined_call_operand.vmem [shape: f32[1,128], index: 5, kind: input, shape index: {}]   ;;  %s1086_s6 = inlined_call_operand.hbm [shape: bf16[128,128], index: 6, kind: input, shape index: {}]   ;;  %s1087_s7 = inlined_call_operand.vmem [shape: f32[1,128], index: 7, kind: input, shape index: {}]   ;;  %s1088_s8 = inlined_call_operand.hbm [shape: f32[8,128], index: 8, kind: output, shape index: {}]  }
   0x1   :  { %14 = vsyncpa [#allocation6], 0 }
   0x2   :  { %15 = vsyncpa [#allocation9], 0 }
   0x3   :  { %16 = vsyncpa [#allocation4], 0  ;;  %s892_s27 = smov [#allocation5]   ;;  %s752_s9 = scalar_lea.hbm %s1081_s1, 1024 }
   0x4   :  { %s32_s28 = sshll.u32 %s892_s27, 4  ;;  %p753_p0 = scmp.ne.s32.totalorder %s1081_s1, %s752_s9  ;;  %s33_s28 = int_to_ptr.vmem [resolvable:$true] %s32_s28 }
   0x5   :  { %p756_p1 = scmp.lt.u32.totalorder %s752_s9, %s1081_s1 }
   0x7   :  { %p758_p2 = pnand %p756_p1, %p753_p0 }
   0x9   :  { %761 = shalt.err (!%p758_p2)
}
   0xa   :  { %s762_s14 = scalar_lea.vmem %s33_s28, 1024  ;;  %p767_p4 = scmp.lt.s32.totalorder %s33_s28, %s33_s28 }
   0xb   :  { %p763_p3 = scmp.ne.s32.totalorder %s33_s28, %s762_s14  ;;  %p768_p5 = scmp.lt.s32.totalorder %s762_s14, %s762_s14 }
   0xd   :  { %p769_p6 = por %p768_p5, %p767_p4 }
   0xf   :  { %p770_p7 = pnand %p769_p6, %p763_p3 }
  0x11   :  { %773 = shalt.err (!%p770_p7)
}
  0x12   :  { %s893_s15 = smov 64   ;;  %s894_s16 = smov 4  }
  0x13   :  { %38 = dma.hbm_to_vmem [thread:$0]  %s1081_s1, 1024, %s33_s28, [#allocation6], %s893_s15, %s893_s15, %s894_s16  }
  0x14   :  { %s895_s19 = smov [#allocation8]   ;;  %s896_s21 = smov [#allocation2]  }
  0x15   :  { %s58_s20 = sshll.u32 %s895_s19, 4  ;;  %s23_s22 = sshll.u32 %s896_s21, 4  ;;  %s59_s20 = int_to_ptr.vmem [resolvable:$true] %s58_s20  ;;  %s24_s22 = int_to_ptr.vmem [resolvable:$true] %s23_s22 }
  0x16   :  { %s774_s25 = scalar_lea.hbm %s1084_s4, 1024 }
  0x17   :  { %p775_p8 = scmp.ne.s32.totalorder %s1084_s4, %s774_s25  ;;  %p778_p9 = scmp.lt.u32.totalorder %s774_s25, %s1084_s4 }
  0x19   :  { %p780_p10 = pnand %p778_p9, %p775_p8 }
  0x1b   :  { %783 = shalt.err (!%p780_p10)
}
  0x1c   :  { %s784_s1 = scalar_lea.vmem %s59_s20, 1024  ;;  %p789_p12 = scmp.lt.s32.totalorder %s59_s20, %s59_s20 }
  0x1d   :  { %p785_p11 = scmp.ne.s32.totalorder %s59_s20, %s784_s1  ;;  %p790_p13 = scmp.lt.s32.totalorder %s784_s1, %s784_s1 }
  0x1f   :  { %p791_p0 = por %p790_p13, %p789_p12 }
  0x21   :  { %p792_p1 = pnand %p791_p0, %p785_p11 }
  0x23   :  { %795 = shalt.err (!%p792_p1)
}
  0x24   :  { %64 = dma.hbm_to_vmem [thread:$0]  %s1084_s4, 1024, %s59_s20, [#allocation9], %s893_s15, %s893_s15, %s894_s16  }
  0x25   :  { %s796_s12 = scalar_lea.hbm %s1080_s0, 128 }
  0x26   :  { %p797_p2 = scmp.ne.s32.totalorder %s1080_s0, %s796_s12  ;;  %p800_p3 = scmp.lt.u32.totalorder %s796_s12, %s1080_s0 }
  0x28   :  { %p802_p4 = pnand %p800_p3, %p797_p2 }
  0x2a   :  { %805 = shalt.err (!%p802_p4)
}
  0x2b   :  { %s806_s19 = scalar_lea.vmem %s24_s22, 128  ;;  %p811_p6 = scmp.lt.s32.totalorder %s24_s22, %s24_s22 }
  0x2c   :  { %p807_p5 = scmp.ne.s32.totalorder %s24_s22, %s806_s19  ;;  %p812_p7 = scmp.lt.s32.totalorder %s806_s19, %s806_s19 }
  0x2e   :  { %p813_p8 = por %p812_p7, %p811_p6 }
  0x30   :  { %p814_p9 = pnand %p813_p8, %p807_p5 }
  0x32   :  { %817 = shalt.err (!%p814_p9)
}
  0x33   :  { %26 = dma.hbm_to_vmem [thread:$0]  %s1080_s0, 128, %s24_s22, [#allocation3]  }
  0x34   :  { %s897_s21 = smov [#allocation7]   ;;  %s898_s24 = smov [#allocation10]  }
  0x35   :  { %s46_s23 = sshll.u32 %s897_s21, 4  ;;  %s72_s25 = sshll.u32 %s898_s24, 4  ;;  %s47_s23 = int_to_ptr.vmem [resolvable:$true] %s46_s23  ;;  %s73_s25 = int_to_ptr.vmem [resolvable:$true] %s72_s25 }
  0x36   :  { %s818_s29 = scalar_lea.hbm %s1083_s3, 1024 }
  0x37   :  { %p819_p10 = scmp.ne.s32.totalorder %s1083_s3, %s818_s29  ;;  %p822_p11 = scmp.lt.u32.totalorder %s818_s29, %s1083_s3 }
  0x39   :  { %p824_p12 = pnand %p822_p11, %p819_p10 }
  0x3b   :  { %827 = shalt.err (!%p824_p12)
}
  0x3c   :  { %s828_s0 = scalar_lea.vmem %s47_s23, 1024  ;;  %p833_p0 = scmp.lt.s32.totalorder %s47_s23, %s47_s23 }
  0x3d   :  { %p829_p13 = scmp.ne.s32.totalorder %s47_s23, %s828_s0  ;;  %p834_p1 = scmp.lt.s32.totalorder %s828_s0, %s828_s0 }
  0x3f   :  { %p835_p2 = por %p834_p1, %p833_p0 }
  0x41   :  { %p836_p3 = pnand %p835_p2, %p829_p13 }
  0x43   :  { %839 = shalt.err (!%p836_p3)
}
  0x44   :  { %52 = dma.hbm_to_vmem [thread:$0]  %s1083_s3, 1024, %s47_s23, [#allocation6], %s893_s15, %s893_s15, %s894_s16  }
  0x45   :  { %s840_s13 = scalar_lea.hbm %s1086_s6, 1024 }
  0x46   :  { %p841_p4 = scmp.ne.s32.totalorder %s1086_s6, %s840_s13  ;;  %p844_p5 = scmp.lt.u32.totalorder %s840_s13, %s1086_s6 }
  0x48   :  { %p846_p6 = pnand %p844_p5, %p841_p4 }
  0x4a   :  { %849 = shalt.err (!%p846_p6)
}
  0x4b   :  { %s850_s4 = scalar_lea.vmem %s73_s25, 1024  ;;  %p855_p8 = scmp.lt.s32.totalorder %s73_s25, %s73_s25 }
  0x4c   :  { %p851_p7 = scmp.ne.s32.totalorder %s73_s25, %s850_s4  ;;  %p856_p9 = scmp.lt.s32.totalorder %s850_s4, %s850_s4 }
  0x4e   :  { %p857_p10 = por %p856_p9, %p855_p8 }
  0x50   :  { %p858_p11 = pnand %p857_p10, %p851_p7 }
  0x52   :  { %861 = shalt.err (!%p858_p11)
}
  0x53   :  { %78 = dma.hbm_to_vmem [thread:$0]  %s1086_s6, 1024, %s73_s25, [#allocation9], %s893_s15, %s893_s15, %s894_s16  }
  0x54   :  { %884 = dma.done.wait [#allocation3], 128  }
  0x55   :  { %885 = vsyncadd [#allocation3], 4294967168 }
  0x56   :  { %886 = dma.done.wait [#allocation6], 2048  }
  0x57   :  { %887 = vsyncadd [#allocation6], 4294965248 }
  0x58   :  { %888 = dma.done.wait [#allocation9], 2048  }
  0x59   :  { %889 = vsyncadd [#allocation9], 4294965248  ;;  %v899_v0 = vmov 0.0   ;;  %vm900_vm0 = vmmov 0   ;;  %v720_v1 = vld [vmem:[#allocation5] sm:$0xff]   ;;  %v721_v2 = vld [vmem:[#allocation5 + $0x8] sm:$0xff]  }
  0x5a   :  { %630 = vmatprep.subr.bf16.mxu0 %v899_v0  ;;  %646 = vmatprep.mubr.msk.bf16.mxu0 %vm900_vm0, %v899_v0  ;;  %v722_v3 = vld [vmem:[#allocation5 + $0x10] sm:$0xff]   ;;  %v728_v4 = vld [vmem:[#allocation8] sm:$0xff]   ;;  %v723_v5 = vld [vmem:[#allocation5 + $0x18] sm:$0xff]   ;;  %s901_s24 = smov [#allocation11]  }
  0x5b   :  { %650 = vmatprep.subr.bf16.mxu1 %v899_v0  ;;  %666 = vmatprep.mubr.msk.bf16.mxu1 %vm900_vm0, %v899_v0  ;;  %v730_v6 = vld [vmem:[#allocation8 + $0x8] sm:$0xff]   ;;  %v724_v7 = vld [vmem:[#allocation5 + $0x20] sm:$0xff]   ;;  %v732_v8 = vld [vmem:[#allocation8 + $0x10] sm:$0xff]   ;;  %s548_s25 = sshll.u32 %s901_s24, 4  ;;  %s549_s25 = int_to_ptr.vmem [resolvable:$true] %s548_s25 }
  0x5c   :  { %631 = vmatpush3.bf16.msra.mxu0 %v720_v1  ;;  %651 = vmatpush3.bf16.msra.mxu1 %v728_v4  ;;  %v725_v9 = vld [vmem:[#allocation5 + $0x28] sm:$0xff]   ;;  %v734_v10 = vld [vmem:[#allocation8 + $0x18] sm:$0xff]   ;;  %v726_v11 = vld [vmem:[#allocation5 + $0x30] sm:$0xff]   ;;  %p867_p13 = scmp.lt.s32.totalorder %s549_s25, %s549_s25 }
  0x5d   :  { %632 = vmatprep.subr.bf16.mxu0 %v899_v0  ;;  %652 = vmatprep.subr.bf16.mxu1 %v899_v0  ;;  %v736_v12 = vld [vmem:[#allocation8 + $0x20] sm:$0xff]   ;;  %v727_v13 = vld [vmem:[#allocation5 + $0x38] sm:$0xff]   ;;  %v738_v15 = vld [vmem:[#allocation8 + $0x28] sm:$0xff]  }
  0x5e   :  { %v97_v14 = vld [vmem:[#allocation2] sm:$0xff]  ;;  %v729_v17 = vld [vmem:[#allocation7] sm:$0xff]   ;;  %v740_v18 = vld [vmem:[#allocation8 + $0x30] sm:$0xff]  }
  0x5f   :  { %v98_v16 = vpack.c.bf16 %v97_v14, %v97_v14  ;;  %v731_v19 = vld [vmem:[#allocation7 + $0x8] sm:$0xff]   ;;  %v733_v20 = vld [vmem:[#allocation7 + $0x10] sm:$0xff]   ;;  %v735_v21 = vld [vmem:[#allocation7 + $0x18] sm:$0xff]  }
  0x60   :  { %633 = vmatpush3.bf16.msra.mxu0 %v721_v2  ;;  %653 = vmatpush3.bf16.msra.mxu1 %v730_v6  ;;  %v737_v22 = vld [vmem:[#allocation7 + $0x20] sm:$0xff]   ;;  %v739_v23 = vld [vmem:[#allocation7 + $0x28] sm:$0xff]   ;;  %v741_v24 = vld [vmem:[#allocation7 + $0x30] sm:$0xff]  }
  0x61   :  { %634 = vmatprep.subr.bf16.mxu0 %v899_v0  ;;  %654 = vmatprep.subr.bf16.mxu1 %v899_v0  ;;  %v742_v25 = vld [vmem:[#allocation8 + $0x38] sm:$0xff]   ;;  %v744_v27 = vld [vmem:[#allocation10] sm:$0xff]   ;;  %v745_v28 = vld [vmem:[#allocation10 + $0x8] sm:$0xff]  }
  0x62   :  { %v743_v26 = vld [vmem:[#allocation7 + $0x38] sm:$0xff]   ;;  %v746_v29 = vld [vmem:[#allocation10 + $0x10] sm:$0xff]   ;;  %v748_v31 = vld [vmem:[#allocation10 + $0x20] sm:$0xff]  }
  0x63   :  { %v747_v30 = vld [vmem:[#allocation10 + $0x18] sm:$0xff]   ;;  %v749_v32 = vld [vmem:[#allocation10 + $0x28] sm:$0xff]   ;;  %v750_v45 = vld [vmem:[#allocation10 + $0x30] sm:$0xff]  }
  0x64   :  { %635 = vmatpush3.bf16.msra.mxu0 %v722_v3  ;;  %655 = vmatpush3.bf16.msra.mxu1 %v732_v8  ;;  %v559_v33 = vld [vmem:[%s1082_s2] ss:$0 sm:$0xff] }
  0x65   :  { %636 = vmatprep.subr.bf16.mxu0 %v899_v0  ;;  %656 = vmatprep.subr.bf16.mxu1 %v899_v0  ;;  %v751_v46 = vld [vmem:[#allocation10 + $0x38] sm:$0xff]  }
  0x66   :  { %v584_v48 = vld [vmem:[%s1085_s5] ss:$0 sm:$0xff]  ;;  %s862_s5 = scalar_lea.vmem %s549_s25, 128 }
  0x67   :  { %v585_v56 = vld [vmem:[%s1087_s7] ss:$0 sm:$0xff]  ;;  %p863_p12 = scmp.ne.s32.totalorder %s549_s25, %s862_s5  ;;  %p868_p0 = scmp.lt.s32.totalorder %s862_s5, %s862_s5 }
  0x68   :  { %637 = vmatpush3.bf16.msra.mxu0 %v723_v5  ;;  %657 = vmatpush3.bf16.msra.mxu1 %v734_v10 }
  0x69   :  { %638 = vmatprep.subr.bf16.mxu0 %v899_v0  ;;  %658 = vmatprep.subr.bf16.mxu1 %v899_v0  ;;  %p869_p1 = por %p868_p0, %p867_p13 }
  0x6b   :  { %p870_p2 = pnand %p869_p1, %p863_p12 }
  0x6c   :  { %639 = vmatpush3.bf16.msra.mxu0 %v724_v7  ;;  %659 = vmatpush3.bf16.msra.mxu1 %v736_v12 }
  0x6d   :  { %640 = vmatprep.subr.bf16.mxu0 %v899_v0  ;;  %660 = vmatprep.subr.bf16.mxu1 %v899_v0 }
  0x70   :  { %641 = vmatpush3.bf16.msra.mxu0 %v725_v9  ;;  %661 = vmatpush3.bf16.msra.mxu1 %v738_v15 }
  0x71   :  { %642 = vmatprep.subr.bf16.mxu0 %v899_v0  ;;  %662 = vmatprep.subr.bf16.mxu1 %v899_v0 }
  0x74   :  { %643 = vmatpush3.bf16.msra.mxu0 %v726_v11  ;;  %663 = vmatpush3.bf16.msra.mxu1 %v740_v18 }
  0x75   :  { %644 = vmatprep.subr.bf16.mxu0 %v899_v0  ;;  %664 = vmatprep.subr.bf16.mxu1 %v899_v0 }
  0x78   :  { %645 = vmatpush3.bf16.msra.mxu0 %v727_v13  ;;  %665 = vmatpush3.bf16.msra.mxu1 %v742_v25 }
  0x79   :  { %670 = vmatprep.subr.bf16.mxu0 %v899_v0  ;;  %690 = vmatprep.subr.bf16.mxu1 %v899_v0 }
  0x7b   :  { %647 = vmatmul.mubr.bf16.vlgmr.msra.gmra.mrb[0].mxu0 %v98_v16  ;;  %667 = vmatmul.mubr.bf16.vlgmr.msra.gmra.mrb[0].mxu1 %v98_v16 }
  0x7c   :  { %671 = vmatpush3.bf16.msra.mxu0 %v729_v17  ;;  %686 = vmatprep.mubr.msk.bf16.mxu0 %vm900_vm0, %v899_v0 }
  0x7d   :  { %672 = vmatprep.subr.bf16.mxu0 %v899_v0  ;;  %706 = vmatprep.mubr.msk.bf16.mxu1 %vm900_vm0, %v899_v0 }
  0x7e   :  { %691 = vmatpush3.bf16.msra.mxu1 %v744_v27 }
  0x7f   :  { %692 = vmatprep.subr.bf16.mxu1 %v899_v0 }
  0x80   :  { %673 = vmatpush3.bf16.msra.mxu0 %v731_v19 }
  0x81   :  { %674 = vmatprep.subr.bf16.mxu0 %v899_v0 }
  0x82   :  { %693 = vmatpush3.bf16.msra.mxu1 %v745_v28 }
  0x83   :  { %694 = vmatprep.subr.bf16.mxu1 %v899_v0 }
  0x84   :  { %675 = vmatpush3.bf16.msra.mxu0 %v733_v20 }
  0x85   :  { %676 = vmatprep.subr.bf16.mxu0 %v899_v0 }
  0x86   :  { %695 = vmatpush3.bf16.msra.mxu1 %v746_v29 }
  0x87   :  { %696 = vmatprep.subr.bf16.mxu1 %v899_v0 }
  0x88   :  { %677 = vmatpush3.bf16.msra.mxu0 %v735_v21 }
  0x89   :  { %678 = vmatprep.subr.bf16.mxu0 %v899_v0 }
  0x8a   :  { %697 = vmatpush3.bf16.msra.mxu1 %v747_v30 }
  0x8b   :  { %698 = vmatprep.subr.bf16.mxu1 %v899_v0 }
  0x8c   :  { %679 = vmatpush3.bf16.msra.mxu0 %v737_v22 }
  0x8d   :  { %680 = vmatprep.subr.bf16.mxu0 %v899_v0 }
  0x8e   :  { %699 = vmatpush3.bf16.msra.mxu1 %v748_v31 }
  0x8f   :  { %700 = vmatprep.subr.bf16.mxu1 %v899_v0 }
  0x90   :  { %681 = vmatpush3.bf16.msra.mxu0 %v739_v23 }
  0x91   :  { %682 = vmatprep.subr.bf16.mxu0 %v899_v0 }
  0x92   :  { %701 = vmatpush3.bf16.msra.mxu1 %v749_v32 }
  0x93   :  { %702 = vmatprep.subr.bf16.mxu1 %v899_v0 }
  0x94   :  { %683 = vmatpush3.bf16.msra.mxu0 %v741_v24 }
  0x95   :  { %684 = vmatprep.subr.bf16.mxu0 %v899_v0 }
  0x96   :  { %703 = vmatpush3.bf16.msra.mxu1 %v750_v45 }
  0x97   :  { %704 = vmatprep.subr.bf16.mxu1 %v899_v0 }
  0x98   :  { %685 = vmatpush3.bf16.msra.mxu0 %v743_v26 }
  0x9a   :  { %705 = vmatpush3.bf16.msra.mxu1 %v751_v46 }
 0x14e   :  { %v204_v34 = vpop.f32.mrb[0].mxu0  ;;  %v326_v41 = vpop.f32.mrb[0].mxu1 }
 0x14f   :  { %v205_v35 = vadd.f32 %v559_v33, %v204_v34  ;;  %v648_v36 = vpop.f32.mrb[1].mxu0  ;;  %v668_v42 = vpop.f32.mrb[1].mxu1 }
 0x150   :  { %v207_v37 = vpop.f32.mrb[2].mxu0  ;;  %v329_v43 = vpop.f32.mrb[2].mxu1 }
 0x151   :  { %v210_v38 = vmax.f32 %v205_v35, 0.0  ;;  %v649_v39 = vpop.f32.mrb[3].mxu0  ;;  %v669_v44 = vpop.f32.mrb[3].mxu1 }
 0x153   :  { %v211_v40 = vpack.c.bf16 %v210_v38, %v210_v38 }
 0x155   :  { %687 = vmatmul.mubr.bf16.vlgmr.msra.gmra.mrb[4].mxu0 %v211_v40 }
 0x228   :  { %v414_v47 = vpop.f32.mrb[4].mxu0 }
 0x229   :  { %v415_v49 = vadd.f32 %v414_v47, %v326_v41  ;;  %v688_v50 = vpop.f32.mrb[5].mxu0 }
 0x22a   :  { %v417_v51 = vpop.f32.mrb[6].mxu0 }
 0x22b   :  { %v427_v52 = vadd.f32 %v584_v48, %v415_v49  ;;  %v689_v53 = vpop.f32.mrb[7].mxu0 }
 0x22d   :  { %v428_v54 = vmax.f32 %v427_v52, 0.0 }
 0x22f   :  { %v429_v55 = vpack.c.bf16 %v428_v54, %v428_v54 }
 0x231   :  { %707 = vmatmul.mubr.bf16.vlgmr.msra.gmra.mrb[4].mxu1 %v429_v55 }
 0x304   :  { %v535_v57 = vpop.f32.mrb[4].mxu1 }
 0x305   :  { %v536_v58 = vadd.f32 %v585_v56, %v535_v57  ;;  %v708_v59 = vpop.f32.mrb[5].mxu1 }
 0x306   :  { %v538_v60 = vpop.f32.mrb[6].mxu1 }
 0x307   :  { %541 = vst [vmem:[#allocation11] sm:$0xff] %v536_v58  ;;  %v709_v61 = vpop.f32.mrb[7].mxu1 }
 0x308   :  { %873 = shalt.err (!%p870_p2)
}
 0x309   :  { %s874_s7 = scalar_lea.hbm %s1088_s8, 128 }
 0x30a   :  { %p875_p3 = scmp.ne.s32.totalorder %s1088_s8, %s874_s7  ;;  %p878_p4 = scmp.lt.u32.totalorder %s874_s7, %s1088_s8 }
 0x30c   :  { %p880_p5 = pnand %p878_p4, %p875_p3 }
 0x30e   :  { %883 = shalt.err (!%p880_p5)
}
 0x30f   :  { %551 = dma.vmem_to_hbm [thread:$0]  %s549_s25, 128, %s1088_s8, [#allocation4]  }
 0x310   :  { %890 = dma.done.wait [#allocation4], 128  }
 0x311   :  { %891 = vsyncadd [#allocation4], 4294967168 }
 0x312   :  { %555 = vsyncpa [#allocation3], 1 }
 0x313   :  { %556 = vsyncpa [#allocation6], 1 }
 0x314   :  { %557 = vsyncpa [#allocation9], 1 }
 0x315   :  { %558 = vsyncpa [#allocation4], 1 }

</bundles_post_ra>
